<compile_context>
chip_gen: v5e
topology: v5e:2x2
jax: 0.10.0
libtpu: 0.0.40
codegen_flags: <defaults>
</compile_context>

<pallas_src>
import functools

import jax
import jax.numpy as jnp
import numpy as np
from jax.experimental import pallas as pl
from jax.experimental.pallas import tpu as pltpu

# ----- model config (small, consistent with the module's forward) -----
BATCH = 2
SEQ = 8            # context_length
EMB = 32           # embedding_dimension
HEADS = 4          # num_heads
HEAD_DIM = EMB // HEADS
FF_DIM = 4 * EMB
EPS = 1e-5
NEG_INF = -1e30    # finite mask value (robust even if a row were ever fully masked)


def _layer_norm(v, g, b):
    mean = jnp.mean(v, axis=-1, keepdims=True)
    var = jnp.mean((v - mean) ** 2, axis=-1, keepdims=True)
    return (v - mean) * jax.lax.rsqrt(var + EPS) * g + b


def _gelu_tanh(v):
    # tanh-approximation GELU (as used by the GPT-from-scratch FeedForwardBlock)
    return 0.5 * v * (1.0 + jnp.tanh(jnp.sqrt(2.0 / jnp.pi) * (v + 0.044715 * v ** 3)))


def transformer_block_kernel(
    x_ref,
    ln1_g_ref, ln1_b_ref,
    wqkv_ref, wo_ref, bo_ref,
    ln2_g_ref, ln2_b_ref,
    w1_ref, b1_ref,
    w2_ref, b2_ref,
    out_ref,
    *, seq, heads, head_dim,
):
    emb = heads * head_dim
    bt = x_ref.shape[0]                       # batch * seq tokens (batch folded)

    x = x_ref[...].astype(jnp.float32)        # (B*T, E)

    # ---------------- attention branch (pre-LN) ----------------
    ln1 = _layer_norm(x, ln1_g_ref[0], ln1_b_ref[0])

    # Transpose-free head split: wqkv_ref is pre-arranged per head as (H, E, 3D) in
    # prepare_params, so one leading-batch einsum emits the head-major QKV tensor
    # directly (same total MACs as the fully fused matmul, zero relayout copies).
    ln1_h = jnp.broadcast_to(ln1.astype(jnp.bfloat16)[None], (heads, bt, emb))
    qkv = jnp.einsum('hte,hed->htd', ln1_h, wqkv_ref[...],
                     preferred_element_type=jnp.float32)          # (H, B*T, 3D)
    q = qkv[:, :, :head_dim].astype(jnp.bfloat16)
    k = qkv[:, :, head_dim:2 * head_dim].astype(jnp.bfloat16)
    v = qkv[:, :, 2 * head_dim:].astype(jnp.bfloat16)

    # Scores for every (head, query, key) at once.
    s = jnp.einsum('hqd,hkd->hqk', q, k,
                   preferred_element_type=jnp.float32)            # (H, B*T, B*T)
    s = s * (1.0 / float(np.sqrt(head_dim)))

    # Causal mask fused with a same-batch (block-diagonal) mask; head-invariant, so
    # built once at (bt, bt) and broadcast inside jnp.where.
    shift = int(np.log2(seq))                                     # seq is a power of two
    row = jax.lax.broadcasted_iota(jnp.int32, (bt, bt), 0)
    col = jax.lax.broadcasted_iota(jnp.int32, (bt, bt), 1)
    keep = (row >= col) & ((row >> shift) == (col >> shift))
    s = jnp.where(keep, s, NEG_INF)

    s = s - jnp.max(s, axis=-1, keepdims=True)
    p = jnp.exp(s)
    p = p * pl.reciprocal(jnp.sum(p, axis=-1, keepdims=True), approx=True)

    ctx = jnp.einsum('hqk,hkd->hqd', p.astype(jnp.bfloat16), v,
                     preferred_element_type=jnp.float32)          # (H, B*T, D)

    # Head merge folded into the output projection (wo pre-reshaped to (H, D, E)):
    #   sum_h ctx_h @ Wo_h  ==  concat_h(ctx_h) @ Wo   -> no lane concatenate needed.
    attn = jnp.einsum('htd,hde->hte', ctx.astype(jnp.bfloat16), wo_ref[...],
                      preferred_element_type=jnp.float32)         # (H, B*T, E)
    attn = jnp.sum(attn, axis=0) + bo_ref[0]                      # (B*T, E)
    x1 = x + attn                             # residual (dropout = identity)

    # ---------------- feed-forward branch (pre-LN) ----------------
    ln2 = _layer_norm(x1, ln2_g_ref[0], ln2_b_ref[0])
    h1 = jnp.dot(ln2.astype(jnp.bfloat16), w1_ref[...],
                 preferred_element_type=jnp.float32) + b1_ref[0]
    h1 = _gelu_tanh(h1)
    ff = jnp.dot(h1.astype(jnp.bfloat16), w2_ref[...],
                 preferred_element_type=jnp.float32) + b2_ref[0]

    out = x1 + ff                             # residual (dropout = identity)
    out_ref[...] = out.astype(out_ref.dtype)


def prepare_params(params):
    """Hoisted weight prep (run ONCE, off the per-call path, per the review):
    per-head fused QKV weight (H, E, 3D), per-head output projection (H, D, E),
    and bf16 casts of every MXU weight operand."""
    (ln1_g, ln1_b, wq, wk, wv, wo, bo, ln2_g, ln2_b, w1, b1, w2, b2) = params
    E, H, D = EMB, HEADS, HEAD_DIM
    # wqkv_h[h, e, :] = [wq[e, h*D:(h+1)*D] | wk[e, ...] | wv[e, ...]]
    wqkv_h = jnp.concatenate(
        [wq.reshape(E, H, D), wk.reshape(E, H, D), wv.reshape(E, H, D)], axis=-1)
    wqkv_h = jnp.transpose(wqkv_h, (1, 0, 2)).astype(jnp.bfloat16)   # (H, E, 3D)
    wo_h = wo.reshape(H, D, E).astype(jnp.bfloat16)                  # (H, D, E)
    return (ln1_g, ln1_b, wqkv_h, wo_h, bo, ln2_g, ln2_b,
            w1.astype(jnp.bfloat16), b1, w2.astype(jnp.bfloat16), b2)


@jax.jit
def transformer_block(x, prepared):
    B, T, E = x.shape
    assert T & (T - 1) == 0, "context_length must be a power of two (mask shift trick)"

    kernel = functools.partial(transformer_block_kernel,
                               seq=T, heads=HEADS, head_dim=E // HEADS)
    vmem = pl.BlockSpec(memory_space=pltpu.MemorySpace.VMEM)
    out = pl.pallas_call(
        kernel,
        out_shape=jax.ShapeDtypeStruct((B * T, E), x.dtype),
        in_specs=[vmem] * 12,
        out_specs=vmem,
    )(x.reshape(B * T, E), *prepared)
    return out.reshape(B, T, E)


def init_params(key):
    ks = jax.random.split(key, 8)
    s = 0.02
    ln1_g = jnp.ones((1, EMB), jnp.float32)
    ln1_b = jnp.zeros((1, EMB), jnp.float32)
    wq = s * jax.random.normal(ks[0], (EMB, EMB), jnp.float32)
    wk = s * jax.random.normal(ks[1], (EMB, EMB), jnp.float32)
    wv = s * jax.random.normal(ks[2], (EMB, EMB), jnp.float32)
    wo = s * jax.random.normal(ks[3], (EMB, EMB), jnp.float32)
    bo = jnp.zeros((1, EMB), jnp.float32)
    ln2_g = jnp.ones((1, EMB), jnp.float32)
    ln2_b = jnp.zeros((1, EMB), jnp.float32)
    w1 = s * jax.random.normal(ks[4], (EMB, FF_DIM), jnp.float32)
    b1 = jnp.zeros((1, FF_DIM), jnp.float32)
    w2 = s * jax.random.normal(ks[5], (FF_DIM, EMB), jnp.float32)
    b2 = jnp.zeros((1, EMB), jnp.float32)
    return [ln1_g, ln1_b, wq, wk, wv, wo, bo, ln2_g, ln2_b, w1, b1, w2, b2]


def reference_forward(x, params):
    (ln1_g, ln1_b, wq, wk, wv, wo, bo, ln2_g, ln2_b, w1, b1, w2, b2) = params
    B, T, E = x.shape
    ln1 = _layer_norm(x, ln1_g[0], ln1_b[0])
    q = ln1 @ wq
    k = ln1 @ wk
    v = ln1 @ wv
    q = q.reshape(B, T, HEADS, HEAD_DIM).transpose(0, 2, 1, 3)
    k = k.reshape(B, T, HEADS, HEAD_DIM).transpose(0, 2, 1, 3)
    v = v.reshape(B, T, HEADS, HEAD_DIM).transpose(0, 2, 1, 3)
    scores = jnp.einsum("bhqd,bhkd->bhqk", q, k) / jnp.sqrt(jnp.float32(HEAD_DIM))
    mask = jnp.tril(jnp.ones((T, T), bool))
    scores = jnp.where(mask, scores, -jnp.inf)
    p = jax.nn.softmax(scores, axis=-1)
    ctx = jnp.einsum("bhqk,bhkd->bhqd", p, v).transpose(0, 2, 1, 3).reshape(B, T, E)
    x1 = x + (ctx @ wo + bo[0])
    ln2 = _layer_norm(x1, ln2_g[0], ln2_b[0])
    h1 = _gelu_tanh(ln2 @ w1 + b1[0])
    return x1 + (h1 @ w2 + b2[0])


if __name__ == "__main__":
    key = jax.random.PRNGKey(0)
    k_x, k_p = jax.random.split(key)
    x = jax.random.normal(k_x, (BATCH, SEQ, EMB), jnp.float32)
    params = init_params(k_p)

    # Weight fusion / casts run exactly once here (not per forward call).
    prepared = jax.block_until_ready(prepare_params(params))

    out = jax.block_until_ready(transformer_block(x, prepared))
    ref = jax.block_until_ready(reference_forward(x, params))

    # bf16 MXU operands + approx reciprocal vs. the f32 reference -> relaxed tolerance.
    np.testing.assert_allclose(np.asarray(out), np.asarray(ref), atol=1e-2, rtol=1e-2)

    print("KERNEL_OK")
</pallas_src>

<mosaic_0001>
module attributes {stable_mosaic.version = 11 : i64} {
  func.func @transformer_block_kernel(%arg0: memref<16x32xf32, #tpu.memory_space<vmem>>, %arg1: memref<1x32xf32, #tpu.memory_space<vmem>>, %arg2: memref<1x32xf32, #tpu.memory_space<vmem>>, %arg3: memref<4x32x24xbf16, #tpu.memory_space<vmem>>, %arg4: memref<4x8x32xbf16, #tpu.memory_space<vmem>>, %arg5: memref<1x32xf32, #tpu.memory_space<vmem>>, %arg6: memref<1x32xf32, #tpu.memory_space<vmem>>, %arg7: memref<1x32xf32, #tpu.memory_space<vmem>>, %arg8: memref<32x128xbf16, #tpu.memory_space<vmem>>, %arg9: memref<1x128xf32, #tpu.memory_space<vmem>>, %arg10: memref<128x32xbf16, #tpu.memory_space<vmem>>, %arg11: memref<1x32xf32, #tpu.memory_space<vmem>>, %arg12: memref<16x32xf32, #tpu.memory_space<vmem>>) attributes {dimension_semantics = [], scalar_prefetch = 0 : i64, scratch_operands = 0 : i64, tpu.core_type = #tpu.core_type<tc>} {
    %c0 = arith.constant 0 : index
    %c0_0 = arith.constant 0 : index
    %0 = vector.load %arg0[%c0, %c0_0] : memref<16x32xf32, #tpu.memory_space<vmem>>, vector<16x32xf32>
    %c0_1 = arith.constant 0 : index
    %c0_2 = arith.constant 0 : index
    %1 = vector.load %arg1[%c0_1, %c0_2] : memref<1x32xf32, #tpu.memory_space<vmem>>, vector<1x32xf32>
    %2 = vector.shape_cast %1 : vector<1x32xf32> to vector<32xf32>
    %c0_3 = arith.constant 0 : index
    %c0_4 = arith.constant 0 : index
    %3 = vector.load %arg2[%c0_3, %c0_4] : memref<1x32xf32, #tpu.memory_space<vmem>>, vector<1x32xf32>
    %4 = vector.shape_cast %3 : vector<1x32xf32> to vector<32xf32>
    %cst = arith.constant dense<0.000000e+00> : vector<16xf32>
    %5 = vector.multi_reduction <add>, %0, %cst [1] : vector<16x32xf32> to vector<16xf32>
    %6 = vector.shape_cast %5 : vector<16xf32> to vector<16x1xf32>
    %cst_5 = arith.constant 3.200000e+01 : f32
    %7 = vector.broadcast %cst_5 : f32 to vector<16x1xf32>
    %8 = arith.divf %6, %7 : vector<16x1xf32>
    %9 = vector.broadcast %8 : vector<16x1xf32> to vector<16x32xf32>
    %10 = arith.subf %0, %9 : vector<16x32xf32>
    %11 = arith.mulf %10, %10 : vector<16x32xf32>
    %cst_6 = arith.constant dense<0.000000e+00> : vector<16xf32>
    %12 = vector.multi_reduction <add>, %11, %cst_6 [1] : vector<16x32xf32> to vector<16xf32>
    %13 = vector.shape_cast %12 : vector<16xf32> to vector<16x1xf32>
    %cst_7 = arith.constant 3.200000e+01 : f32
    %14 = vector.broadcast %cst_7 : f32 to vector<16x1xf32>
    %15 = arith.divf %13, %14 : vector<16x1xf32>
    %16 = vector.broadcast %8 : vector<16x1xf32> to vector<16x32xf32>
    %17 = arith.subf %0, %16 : vector<16x32xf32>
    %cst_8 = arith.constant 9.99999974E-6 : f32
    %18 = vector.broadcast %cst_8 : f32 to vector<16x1xf32>
    %19 = arith.addf %15, %18 : vector<16x1xf32>
    %20 = math.rsqrt %19 : vector<16x1xf32>
    %21 = vector.broadcast %20 : vector<16x1xf32> to vector<16x32xf32>
    %22 = arith.mulf %17, %21 : vector<16x32xf32>
    %23 = vector.shape_cast %2 : vector<32xf32> to vector<1x32xf32>
    %24 = vector.broadcast %23 : vector<1x32xf32> to vector<16x32xf32>
    %25 = arith.mulf %22, %24 : vector<16x32xf32>
    %26 = vector.shape_cast %4 : vector<32xf32> to vector<1x32xf32>
    %27 = vector.broadcast %26 : vector<1x32xf32> to vector<16x32xf32>
    %28 = arith.addf %25, %27 : vector<16x32xf32>
    %29 = arith.truncf %28 : vector<16x32xf32> to vector<16x32xbf16>
    %30 = vector.shape_cast %29 : vector<16x32xbf16> to vector<1x16x32xbf16>
    %31 = vector.shape_cast %30 : vector<1x16x32xbf16> to vector<1x16x32xbf16>
    %32 = vector.broadcast %31 : vector<1x16x32xbf16> to vector<4x16x32xbf16>
    %c0_9 = arith.constant 0 : index
    %c0_10 = arith.constant 0 : index
    %c0_11 = arith.constant 0 : index
    %33 = vector.load %arg3[%c0_9, %c0_10, %c0_11] : memref<4x32x24xbf16, #tpu.memory_space<vmem>>, vector<4x32x24xbf16>
    "tpu.trace_start"() <{level = 10 : i32, message = "hte,hed->htd"}> : () -> ()
    %cst_12 = arith.constant dense<0.000000e+00> : vector<4x16x24xf32>
    %34 = tpu.matmul %32, %33, %cst_12 {dimension_numbers = #tpu.dot_dimension_numbers<[2], [1], [1], [2], [0, 0, 0, 1, 1, 2], [0], [0]>} : vector<4x16x32xbf16>, vector<4x32x24xbf16>, vector<4x16x24xf32> -> vector<4x16x24xf32>
    "tpu.trace_stop"() : () -> ()
    %35 = vector.extract_strided_slice %34 {offsets = [0, 0, 0], sizes = [4, 16, 8], strides = [1, 1, 1]} : vector<4x16x24xf32> to vector<4x16x8xf32>
    %36 = arith.truncf %35 : vector<4x16x8xf32> to vector<4x16x8xbf16>
    %37 = vector.extract_strided_slice %34 {offsets = [0, 0, 8], sizes = [4, 16, 8], strides = [1, 1, 1]} : vector<4x16x24xf32> to vector<4x16x8xf32>
    %38 = arith.truncf %37 : vector<4x16x8xf32> to vector<4x16x8xbf16>
    %39 = vector.extract_strided_slice %34 {offsets = [0, 0, 16], sizes = [4, 16, 8], strides = [1, 1, 1]} : vector<4x16x24xf32> to vector<4x16x8xf32>
    %40 = arith.truncf %39 : vector<4x16x8xf32> to vector<4x16x8xbf16>
    "tpu.trace_start"() <{level = 10 : i32, message = "hqd,hkd->hqk"}> : () -> ()
    %cst_13 = arith.constant dense<0.000000e+00> : vector<4x16x16xf32>
    %41 = tpu.matmul %36, %38, %cst_13 {dimension_numbers = #tpu.dot_dimension_numbers<[2], [2], [1], [1], [0, 0, 0, 1, 1, 1], [0], [0]>} : vector<4x16x8xbf16>, vector<4x16x8xbf16>, vector<4x16x16xf32> -> vector<4x16x16xf32>
    "tpu.trace_stop"() : () -> ()
    %cst_14 = arith.constant 0.353553385 : f32
    %42 = vector.broadcast %cst_14 : f32 to vector<4x16x16xf32>
    %43 = arith.mulf %41, %42 : vector<4x16x16xf32>
    %44 = tpu.iota {dimensions = array<i32: 0>} : vector<16x16xi32>
    %45 = tpu.iota {dimensions = array<i32: 1>} : vector<16x16xi32>
    %46 = arith.cmpi sge, %44, %45 : vector<16x16xi32>
    %c3_i32 = arith.constant 3 : i32
    %47 = vector.broadcast %c3_i32 : i32 to vector<16x16xi32>
    %48 = arith.shrsi %44, %47 : vector<16x16xi32>
    %c3_i32_15 = arith.constant 3 : i32
    %49 = vector.broadcast %c3_i32_15 : i32 to vector<16x16xi32>
    %50 = arith.shrsi %45, %49 : vector<16x16xi32>
    %51 = arith.cmpi eq, %48, %50 : vector<16x16xi32>
    %52 = arith.andi %46, %51 : vector<16x16xi1>
    %cst_16 = arith.constant -1.000000e+30 : f32
    %53 = vector.shape_cast %52 : vector<16x16xi1> to vector<1x16x16xi1>
    %54 = vector.broadcast %53 : vector<1x16x16xi1> to vector<4x16x16xi1>
    %55 = vector.broadcast %cst_16 : f32 to vector<4x16x16xf32>
    %56 = arith.select %54, %43, %55 : vector<4x16x16xi1>, vector<4x16x16xf32>
    %cst_17 = arith.constant dense<0xFF800000> : vector<4x16xf32>
    %57 = vector.multi_reduction <maximumf>, %56, %cst_17 [2] : vector<4x16x16xf32> to vector<4x16xf32>
    %58 = vector.shape_cast %57 : vector<4x16xf32> to vector<4x16x1xf32>
    %59 = vector.broadcast %58 : vector<4x16x1xf32> to vector<4x16x16xf32>
    %60 = arith.subf %56, %59 : vector<4x16x16xf32>
    %61 = math.exp %60 : vector<4x16x16xf32>
    %cst_18 = arith.constant dense<0.000000e+00> : vector<4x16xf32>
    %62 = vector.multi_reduction <add>, %61, %cst_18 [2] : vector<4x16x16xf32> to vector<4x16xf32>
    %63 = vector.shape_cast %62 : vector<4x16xf32> to vector<4x16x1xf32>
    %64 = tpu.reciprocal %63 {approx = true} : vector<4x16x1xf32> -> vector<4x16x1xf32>
    %65 = vector.broadcast %64 : vector<4x16x1xf32> to vector<4x16x16xf32>
    %66 = arith.mulf %61, %65 : vector<4x16x16xf32>
    %67 = arith.truncf %66 : vector<4x16x16xf32> to vector<4x16x16xbf16>
    "tpu.trace_start"() <{level = 10 : i32, message = "hqk,hkd->hqd"}> : () -> ()
    %cst_19 = arith.constant dense<0.000000e+00> : vector<4x16x8xf32>
    %68 = tpu.matmul %67, %40, %cst_19 {dimension_numbers = #tpu.dot_dimension_numbers<[2], [1], [1], [2], [0, 0, 0, 1, 1, 2], [0], [0]>} : vector<4x16x16xbf16>, vector<4x16x8xbf16>, vector<4x16x8xf32> -> vector<4x16x8xf32>
    "tpu.trace_stop"() : () -> ()
    %69 = arith.truncf %68 : vector<4x16x8xf32> to vector<4x16x8xbf16>
    %c0_20 = arith.constant 0 : index
    %c0_21 = arith.constant 0 : index
    %c0_22 = arith.constant 0 : index
    %70 = vector.load %arg4[%c0_20, %c0_21, %c0_22] : memref<4x8x32xbf16, #tpu.memory_space<vmem>>, vector<4x8x32xbf16>
    "tpu.trace_start"() <{level = 10 : i32, message = "htd,hde->hte"}> : () -> ()
    %cst_23 = arith.constant dense<0.000000e+00> : vector<4x16x32xf32>
    %71 = tpu.matmul %69, %70, %cst_23 {dimension_numbers = #tpu.dot_dimension_numbers<[2], [1], [1], [2], [0, 0, 0, 1, 1, 2], [0], [0]>} : vector<4x16x8xbf16>, vector<4x8x32xbf16>, vector<4x16x32xf32> -> vector<4x16x32xf32>
    "tpu.trace_stop"() : () -> ()
    %cst_24 = arith.constant dense<0.000000e+00> : vector<16x32xf32>
    %72 = vector.multi_reduction <add>, %71, %cst_24 [0] : vector<4x16x32xf32> to vector<16x32xf32>
    %c0_25 = arith.constant 0 : index
    %c0_26 = arith.constant 0 : index
    %73 = vector.load %arg5[%c0_25, %c0_26] : memref<1x32xf32, #tpu.memory_space<vmem>>, vector<1x32xf32>
    %74 = vector.shape_cast %73 : vector<1x32xf32> to vector<32xf32>
    %75 = vector.shape_cast %74 : vector<32xf32> to vector<1x32xf32>
    %76 = vector.broadcast %75 : vector<1x32xf32> to vector<16x32xf32>
    %77 = arith.addf %72, %76 : vector<16x32xf32>
    %78 = arith.addf %0, %77 : vector<16x32xf32>
    %c0_27 = arith.constant 0 : index
    %c0_28 = arith.constant 0 : index
    %79 = vector.load %arg6[%c0_27, %c0_28] : memref<1x32xf32, #tpu.memory_space<vmem>>, vector<1x32xf32>
    %80 = vector.shape_cast %79 : vector<1x32xf32> to vector<32xf32>
    %c0_29 = arith.constant 0 : index
    %c0_30 = arith.constant 0 : index
    %81 = vector.load %arg7[%c0_29, %c0_30] : memref<1x32xf32, #tpu.memory_space<vmem>>, vector<1x32xf32>
    %82 = vector.shape_cast %81 : vector<1x32xf32> to vector<32xf32>
    %cst_31 = arith.constant dense<0.000000e+00> : vector<16xf32>
    %83 = vector.multi_reduction <add>, %78, %cst_31 [1] : vector<16x32xf32> to vector<16xf32>
    %84 = vector.shape_cast %83 : vector<16xf32> to vector<16x1xf32>
    %cst_32 = arith.constant 3.200000e+01 : f32
    %85 = vector.broadcast %cst_32 : f32 to vector<16x1xf32>
    %86 = arith.divf %84, %85 : vector<16x1xf32>
    %87 = vector.broadcast %86 : vector<16x1xf32> to vector<16x32xf32>
    %88 = arith.subf %78, %87 : vector<16x32xf32>
    %89 = arith.mulf %88, %88 : vector<16x32xf32>
    %cst_33 = arith.constant dense<0.000000e+00> : vector<16xf32>
    %90 = vector.multi_reduction <add>, %89, %cst_33 [1] : vector<16x32xf32> to vector<16xf32>
    %91 = vector.shape_cast %90 : vector<16xf32> to vector<16x1xf32>
    %cst_34 = arith.constant 3.200000e+01 : f32
    %92 = vector.broadcast %cst_34 : f32 to vector<16x1xf32>
    %93 = arith.divf %91, %92 : vector<16x1xf32>
    %94 = vector.broadcast %86 : vector<16x1xf32> to vector<16x32xf32>
    %95 = arith.subf %78, %94 : vector<16x32xf32>
    %cst_35 = arith.constant 9.99999974E-6 : f32
    %96 = vector.broadcast %cst_35 : f32 to vector<16x1xf32>
    %97 = arith.addf %93, %96 : vector<16x1xf32>
    %98 = math.rsqrt %97 : vector<16x1xf32>
    %99 = vector.broadcast %98 : vector<16x1xf32> to vector<16x32xf32>
    %100 = arith.mulf %95, %99 : vector<16x32xf32>
    %101 = vector.shape_cast %80 : vector<32xf32> to vector<1x32xf32>
    %102 = vector.broadcast %101 : vector<1x32xf32> to vector<16x32xf32>
    %103 = arith.mulf %100, %102 : vector<16x32xf32>
    %104 = vector.shape_cast %82 : vector<32xf32> to vector<1x32xf32>
    %105 = vector.broadcast %104 : vector<1x32xf32> to vector<16x32xf32>
    %106 = arith.addf %103, %105 : vector<16x32xf32>
    %107 = arith.truncf %106 : vector<16x32xf32> to vector<16x32xbf16>
    %c0_36 = arith.constant 0 : index
    %c0_37 = arith.constant 0 : index
    %108 = vector.load %arg8[%c0_36, %c0_37] : memref<32x128xbf16, #tpu.memory_space<vmem>>, vector<32x128xbf16>
    %cst_38 = arith.constant dense<0.000000e+00> : vector<16x128xf32>
    %109 = tpu.matmul %107, %108, %cst_38 {dimension_numbers = #tpu.dot_dimension_numbers<[1], [0], [0], [1], [0, 0, 1, 1], [], []>} : vector<16x32xbf16>, vector<32x128xbf16>, vector<16x128xf32> -> vector<16x128xf32>
    %c0_39 = arith.constant 0 : index
    %c0_40 = arith.constant 0 : index
    %110 = vector.load %arg9[%c0_39, %c0_40] : memref<1x128xf32, #tpu.memory_space<vmem>>, vector<1x128xf32>
    %111 = vector.shape_cast %110 : vector<1x128xf32> to vector<128xf32>
    %112 = vector.shape_cast %111 : vector<128xf32> to vector<1x128xf32>
    %113 = vector.broadcast %112 : vector<1x128xf32> to vector<16x128xf32>
    %114 = arith.addf %109, %113 : vector<16x128xf32>
    %cst_41 = arith.constant 5.000000e-01 : f32
    %115 = vector.broadcast %cst_41 : f32 to vector<16x128xf32>
    %116 = arith.mulf %115, %114 : vector<16x128xf32>
    %cst_42 = arith.constant 0.636619746 : f32
    %117 = math.sqrt %cst_42 : f32
    %118 = arith.mulf %114, %114 : vector<16x128xf32>
    %119 = arith.mulf %114, %118 : vector<16x128xf32>
    %cst_43 = arith.constant 4.471500e-02 : f32
    %120 = vector.broadcast %cst_43 : f32 to vector<16x128xf32>
    %121 = arith.mulf %120, %119 : vector<16x128xf32>
    %122 = arith.addf %114, %121 : vector<16x128xf32>
    %123 = vector.broadcast %117 : f32 to vector<16x128xf32>
    %124 = arith.mulf %123, %122 : vector<16x128xf32>
    %125 = math.tanh %124 : vector<16x128xf32>
    %cst_44 = arith.constant 1.000000e+00 : f32
    %126 = vector.broadcast %cst_44 : f32 to vector<16x128xf32>
    %127 = arith.addf %126, %125 : vector<16x128xf32>
    %128 = arith.mulf %116, %127 : vector<16x128xf32>
    %129 = arith.truncf %128 : vector<16x128xf32> to vector<16x128xbf16>
    %c0_45 = arith.constant 0 : index
    %c0_46 = arith.constant 0 : index
    %130 = vector.load %arg10[%c0_45, %c0_46] : memref<128x32xbf16, #tpu.memory_space<vmem>>, vector<128x32xbf16>
    %cst_47 = arith.constant dense<0.000000e+00> : vector<16x32xf32>
    %131 = tpu.matmul %129, %130, %cst_47 {dimension_numbers = #tpu.dot_dimension_numbers<[1], [0], [0], [1], [0, 0, 1, 1], [], []>} : vector<16x128xbf16>, vector<128x32xbf16>, vector<16x32xf32> -> vector<16x32xf32>
    %c0_48 = arith.constant 0 : index
    %c0_49 = arith.constant 0 : index
    %132 = vector.load %arg11[%c0_48, %c0_49] : memref<1x32xf32, #tpu.memory_space<vmem>>, vector<1x32xf32>
    %133 = vector.shape_cast %132 : vector<1x32xf32> to vector<32xf32>
    %134 = vector.shape_cast %133 : vector<32xf32> to vector<1x32xf32>
    %135 = vector.broadcast %134 : vector<1x32xf32> to vector<16x32xf32>
    %136 = arith.addf %131, %135 : vector<16x32xf32>
    %137 = arith.addf %78, %136 : vector<16x32xf32>
    %c0_50 = arith.constant 0 : index
    %c0_51 = arith.constant 0 : index
    %138 = vector.load %arg12[%c0_50, %c0_51] : memref<16x32xf32, #tpu.memory_space<vmem>>, vector<16x32xf32>
    tpu.vector_store %arg12[%c0_50, %c0_51], %137 {strides = array<i32>} : memref<16x32xf32, #tpu.memory_space<vmem>>, vector<16x32xf32>,
    return
  }
}

</mosaic_0001>

<bundles_post_ra>
// kernel: transformer_block.1
= control target key start
LH: loop header
LB: loop body
LE: loop exit
PB: predicated region body
PF: predicated region fallthrough
CT: control target
= control target key end

     0   :  { %vm47_vm0 = vcmask 261120   ;;  %s1451_s0 = inlined_call_operand.vmem [shape: f32[16,32], index: 0, kind: input, shape index: {}]   ;;  %s1452_s1 = inlined_call_operand.vmem [shape: f32[1,32], index: 1, kind: input, shape index: {}]   ;;  %s1453_s2 = inlined_call_operand.vmem [shape: f32[1,32], index: 2, kind: input, shape index: {}]   ;;  %s1454_s3 = inlined_call_operand.vmem [shape: bf16[4,32,24], index: 3, kind: input, shape index: {}]   ;;  %s1455_s4 = inlined_call_operand.vmem [shape: bf16[4,8,32], index: 4, kind: input, shape index: {}]   ;;  %s1456_s5 = inlined_call_operand.vmem [shape: f32[1,32], index: 5, kind: input, shape index: {}]   ;;  %s1457_s6 = inlined_call_operand.vmem [shape: f32[1,32], index: 6, kind: input, shape index: {}]   ;;  %s1458_s7 = inlined_call_operand.vmem [shape: f32[1,32], index: 7, kind: input, shape index: {}]   ;;  %s1459_s8 = inlined_call_operand.vmem [shape: bf16[32,128], index: 8, kind: input, shape index: {}]   ;;  %s1460_s9 = inlined_call_operand.vmem [shape: f32[1,128], index: 9, kind: input, shape index: {}]   ;;  %s1461_s10 = inlined_call_operand.vmem [shape: bf16[128,32], index: 10, kind: input, shape index: {}]   ;;  %s1462_s11 = inlined_call_operand.vmem [shape: f32[1,32], index: 11, kind: input, shape index: {}]   ;;  %s1463_s12 = inlined_call_operand.hbm [shape: f32[16,32], index: 12, kind: output, shape index: {}]  }
   0x1   :  { %v1205_v0 = vld [vmem:[%s1451_s0] sm:$0xff] }
   0x2   :  { %v48_v1 = vsel %vm47_vm0, %v1205_v0, 0.0 }
   0x3   :  { %49 = vadd.xlane.f32.xlu0 %v48_v1 }
   0x4   :  { %17 = vsyncpa [#allocation3], 0  ;;  %v1212_v2 = vld [vmem:[%s1451_s0 + $0x8] sm:$0xff]  ;;  %v1131_v4 = vmov 32.0   ;;  %v1031_v24 = vld [vmem:[%s1454_s3 + $0x18] sm:$0xff]  ;;  %vm254_vm8 = vcmask 64512  }
   0x5   :  { %v51_v3 = vsel %vm47_vm0, %v1212_v2, 0.0  ;;  %1059 = vrcp.f32 %v1131_v4  ;;  %v1029_v23 = vld [vmem:[%s1454_s3 + $0x8] sm:$0xff]  ;;  %v1035_v25 = vld [vmem:[%s1454_s3 + $0x38] sm:$0xff]  ;;  %179 = vmatpush.bf16.msra.mxu2 %v1031_v24  ;;  %v1028_v27 = vld [vmem:[%s1454_s3] sm:$0xff]  ;;  %vm390_vm12 = vcmask 130048   ;;  %s1134_s14 = smov [#allocation2]  }
   0x6   :  { %153 = vmatpush.bf16.msra.mxu0 %v1029_v23  ;;  %v1030_v28 = vld [vmem:[%s1454_s3 + $0x10] sm:$0xff]  ;;  %231 = vmatpush.bf16.msra.mxu3 %v1035_v25  ;;  %v1033_v35 = vld [vmem:[%s1454_s3 + $0x28] sm:$0xff]  ;;  %v1032_v37 = vld [vmem:[%s1454_s3 + $0x20] sm:$0xff]  ;;  %s927_s17 = sshll.u32 %s1463_s12, 4  ;;  %s928_s17 = int_to_ptr.hbm [resolvable:$true] %s927_s17 }
   0x7   :  { %v1034_v29 = vld [vmem:[%s1454_s3 + $0x30] sm:$0xff]  ;;  %v1052_v45 = vld [vmem:[%s1452_s1] ss:$0 sm:$0xff]  ;;  %s1132_s1 = smov 120  }
   0x8   :  { %v1053_v50 = vld [vmem:[%s1453_s2] ss:$0 sm:$0xff]  ;;  %s1133_s2 = smov 112  }
   0x9   :  { %180 = vmatpush.bf16.msra.mxu2 %v1030_v28 }
   0xa   :  { %154 = vmatpush.bf16.msra.mxu0 %v1028_v27  ;;  %232 = vmatpush.bf16.msra.mxu3 %v1034_v29 }
   0xb   :  { %52 = vadd.xlane.f32.xlu0 %v51_v3  ;;  %v1060_v5 = vpop.eup %1059 }
   0xc   :  { %v55_v6 = vmul.f32 32.0, %v1060_v5  ;;  %vm59_vm1 = vweird.f32 %v1060_v5 }
   0xd   :  { %205 = vmatpush.bf16.msrb.mxu2 %v1033_v35 }
   0xe   :  { %v56_v7 = vsub.f32 1.0, %v55_v6 }
  0x10   :  { %v57_v8 = vmul.f32 %v1060_v5, %v56_v7 }
  0x11   :  { %206 = vmatpush.bf16.msrb.mxu2 %v1032_v37  ;;  %v364_v37 = vlaneseq }
  0x12   :  { %v58_v9 = vadd.f32 %v1060_v5, %v57_v8 }
  0x14   :  { %v1216_v10 = vsel %vm59_vm1, %v1060_v5, %v58_v9  ;;  %vm607_vm1 = vcmask 1043456  }
  0x76   :  { %v50_v11 = vpop.xlane.xlu0 %49 }
  0x77   :  { %v61_v12 = vmul.f32 %v1216_v10, %v50_v11 }
  0x79   :  { %v63_v13 = vsub.f32 %v1205_v0, %v61_v12 }
  0x7b   :  { %v65_v14 = vmul.f32 %v63_v13, %v63_v13 }
  0x7d   :  { %v67_v15 = vsel %vm47_vm0, %v65_v14, 0.0 }
  0x7e   :  { %68 = vadd.xlane.f32.xlu1 %v67_v15  ;;  %v53_v16 = vpop.xlane.xlu0 %52 }
  0x7f   :  { %v62_v17 = vmul.f32 %v1216_v10, %v53_v16 }
  0x81   :  { %v64_v18 = vsub.f32 %v1212_v2, %v62_v17 }
  0x83   :  { %v66_v19 = vmul.f32 %v64_v18, %v64_v18 }
  0x85   :  { %v70_v20 = vsel %vm47_vm0, %v66_v19, 0.0 }
  0x86   :  { %71 = vadd.xlane.f32.xlu1 %v70_v20 }
  0xf1   :  { %v69_v21 = vpop.xlane.xlu1 %68 }
  0xf2   :  { %v73_v22 = vmul.f32 %v69_v21, %v1216_v10 }
  0xf4   :  { %v75_v26 = vadd.f32 1e-05, %v73_v22 }
  0xf6   :  { %1061 = vrsqrt.f32 %v75_v26  ;;  %vm83_vm3 = vweird.f32 %v75_v26 }
  0xf9   :  { %v72_v30 = vpop.xlane.xlu1 %71 }
  0xfa   :  { %v74_v31 = vmul.f32 %v72_v30, %v1216_v10 }
  0xfc   :  { %v1062_v32 = vpop.eup %1061  ;;  %v76_v33 = vadd.f32 1e-05, %v74_v31 }
  0xfd   :  { %v78_v34 = vmul.f32 %v1062_v32, %v75_v26  ;;  %vm84_vm2 = vweird.f32 %v1062_v32 }
  0xfe   :  { %1063 = vrsqrt.f32 %v76_v33  ;;  %vm85_vm4 = vmor %vm83_vm3, %vm84_vm2  ;;  %vm93_vm6 = vweird.f32 %v76_v33 }
  0xff   :  { %v79_v36 = vmul.f32 %v1062_v32, %v78_v34 }
 0x101   :  { %v80_v38 = vmul.f32 0.5, %v79_v36 }
 0x103   :  { %v81_v39 = vsub.f32 1.5, %v80_v38  ;;  %v365_v38 = vshrl.u32 %v364_v37, 7 }
 0x104   :  { %v1064_v40 = vpop.eup %1063 }
 0x105   :  { %v82_v41 = vmul.f32 %v1062_v32, %v81_v39  ;;  %v88_v42 = vmul.f32 %v1064_v40, %v76_v33  ;;  %vm94_vm5 = vweird.f32 %v1064_v40  ;;  %v368_v39 = vand.u32 127, %v364_v37 }
 0x106   :  { %vm95_vm7 = vmor %vm93_vm6, %vm94_vm5 }
 0x107   :  { %v86_v43 = vsel %vm85_vm4, %v1062_v32, %v82_v41  ;;  %v89_v44 = vmul.f32 %v1064_v40, %v88_v42  ;;  %v373_v41 = vshra.s32 %v368_v39, 3  ;;  %vm369_vm9 = vcmp.ge.s32.totalorder %v365_v38, %v368_v39 }
 0x108   :  { %v97_v46 = vmul.f32 %v86_v43, %v63_v13  ;;  %v366_v42 = vadd.s32 8, %v365_v38 }
 0x109   :  { %v90_v47 = vmul.f32 0.5, %v89_v44 }
 0x10a   :  { %v102_v49 = vmul.f32 %v1052_v45, %v97_v46  ;;  %vm370_vm13 = vcmp.ge.s32.totalorder %v366_v42, %v368_v39 }
 0x10b   :  { %v91_v48 = vsub.f32 1.5, %v90_v47  ;;  %v372_v47 = vshra.s32 %v366_v42, 3 }
 0x10c   :  { %v107_v54 = vadd.f32 %v1053_v50, %v102_v49 }
 0x10d   :  { %v92_v51 = vmul.f32 %v1064_v40, %v91_v48  ;;  %vm375_vm14 = vcmp.eq.s32.totalorder %v372_v47, %v373_v41 }
 0x10e   :  { %v109_v57 = vpack.c.bf16 %v107_v54, %v107_v54  ;;  %vm1294_vm15 = vmand %vm370_vm13, %vm375_vm14 }
 0x10f   :  { %v96_v52 = vsel %vm95_vm7, %v1064_v40, %v92_v51  ;;  %v371_v40 = vshra.s32 %v365_v38, 3 }
 0x110   :  { %v98_v53 = vmul.f32 %v96_v52, %v64_v18  ;;  %v129_v59 = vunpack.c.l.b16 %v109_v57 }
 0x111   :  { %vm374_vm10 = vcmp.eq.s32.totalorder %v371_v40, %v373_v41 }
 0x112   :  { %v103_v55 = vmul.f32 %v1052_v45, %v98_v53  ;;  %vm1284_vm11 = vmand %vm369_vm9, %vm374_vm10 }
 0x114   :  { %v108_v56 = vadd.f32 %v1053_v50, %v103_v55 }
 0x116   :  { %v110_v58 = vpack.c.bf16 %v108_v56, %v108_v56 }
 0x118   :  { %v130_v60 = vunpack.c.l.b16 %v110_v58 }
 0x11a   :  { %v131_v61 = vpack.c.b16 %v130_v60, %v129_v59 }
 0x11c   :  { %947 = vmatmul.msk.bf16.vlgmr.msra.gmra.mxu0 %vm47_vm0, %v131_v61  ;;  %956 = vmatmul.msk.bf16.vlgmr.msra.gmra.mxu2 %vm47_vm0, %v131_v61 }
 0x11d   :  { %974 = vmatmul.msk.bf16.vlgmr.msra.gmra.mxu3 %vm47_vm0, %v131_v61 }
 0x12c   :  { %965 = vmatmul.msk.bf16.vlgmr.msrb.gmra.mxu2 %vm47_vm0, %v131_v61 }
 0x199   :  { %v156_v62 = vpop.f32.mrf.mxu0 }
 0x19a   :  { %v239_v1 = vpack.c.bf16 %v156_v62, %v156_v62 }
 0x19c   :  { %v249_v5 = vunpack.c.l.b16 %v239_v1 }
 0x19f   :  { %v182_v63 = vpop.f32.mrf.mxu2 }
 0x1a0   :  { %v241_v7 = vpack.c.bf16 %v182_v63, %v182_v63  ;;  %v234_v15 = vpop.f32.mrf.mxu3 }
 0x1a1   :  { %v158_v3 = vpop.f32.mrf.mxu0  ;;  %v245_v25 = vpack.c.bf16 %v234_v15, %v234_v15 }
 0x1a2   :  { %v240_v4 = vpack.c.bf16 %v158_v3, %v158_v3  ;;  %v277_v12 = vunpack.c.l.b16 %v241_v7 }
 0x1a3   :  { %v331_v27 = vunpack.c.l.b16 %v245_v25 }
 0x1a4   :  { %v250_v6 = vunpack.c.l.b16 %v240_v4 }
 0x1a6   :  { %v1260_v8 = vpack.c.b16 %v250_v6, %v249_v5 }
 0x1a7   :  { %v184_v9 = vpop.f32.mrf.mxu2 }
 0x1a8   :  { %v242_v11 = vpack.c.bf16 %v184_v9, %v184_v9  ;;  %252 = vrot.lane.b32.xlu0 %v1260_v8, %s1132_s1  ;;  %v236_v20 = vpop.f32.mrf.mxu3 }
 0x1a9   :  { %v246_v23 = vpack.c.bf16 %v236_v20, %v236_v20 }
 0x1aa   :  { %v278_v13 = vunpack.c.l.b16 %v242_v11 }
 0x1ab   :  { %v332_v26 = vunpack.c.l.b16 %v246_v23 }
 0x1ac   :  { %v1263_v14 = vpack.c.b16 %v278_v13, %v277_v12 }
 0x1ad   :  { %v1269_v28 = vpack.c.b16 %v332_v26, %v331_v27 }
 0x1ae   :  { %280 = vrot.lane.b32.xlu1 %v1263_v14, %s1132_s1 }
 0x1af   :  { %v208_v16 = vpop.f32.mrf.mxu2 }
 0x1b0   :  { %v243_v17 = vpack.c.bf16 %v208_v16, %v208_v16 }
 0x1b2   :  { %v304_v21 = vunpack.c.l.b16 %v243_v17 }
 0x1b7   :  { %v210_v18 = vpop.f32.mrf.mxu2 }
 0x1b8   :  { %v244_v19 = vpack.c.bf16 %v210_v18, %v210_v18 }
 0x1ba   :  { %v305_v22 = vunpack.c.l.b16 %v244_v19 }
 0x1bc   :  { %v1266_v24 = vpack.c.b16 %v305_v22, %v304_v21 }
 0x1be   :  { %307 = vrot.lane.b32.xlu2 %v1266_v24, %s1132_s1 }
 0x1c6   :  { %334 = vrot.lane.b32.xlu2 %v1269_v28, %s1132_s1 }
 0x218   :  { %v308_v29 = vpop.permute.xlu2 %307 }
 0x219   :  { %v313_v30 = vsel %vm254_vm8, %v308_v29, 0 }
 0x21a   :  { %322 = vmatpush.bf16.xpose.msra.mxu2 %v313_v30  ;;  %v253_v31 = vpop.permute.xlu0 %252 }
 0x21b   :  { %v259_v32 = vsel %vm254_vm8, %v253_v31, 0 }
 0x21c   :  { %268 = vmatpush.bf16.xpose.msrb.mxu0 %v259_v32 }
 0x220   :  { %v281_v33 = vpop.permute.xlu1 %280  ;;  %v335_v34 = vpop.permute.xlu2 %334 }
 0x221   :  { %977 = vmatmul.msk.bf16.vlgmr.msra.gmra.mxu2 %vm254_vm8, %v1266_v24  ;;  %v286_v35 = vsel %vm254_vm8, %v281_v33, 0  ;;  %v340_v36 = vsel %vm254_vm8, %v335_v34, 0 }
 0x222   :  { %295 = vmatpush.bf16.xpose.msra.mxu1 %v286_v35  ;;  %349 = vmatpush.bf16.xpose.msrb.mxu3 %v340_v36 }
 0x223   :  { %975 = vmatmul.msk.bf16.vlgmr.msrb.gmra.mxu0 %vm254_vm8, %v1260_v8 }
 0x229   :  { %976 = vmatmul.msk.bf16.vlgmr.msra.gmra.mxu1 %vm254_vm8, %v1263_v14  ;;  %978 = vmatmul.msk.bf16.vlgmr.msrb.gmra.mxu3 %vm254_vm8, %v1269_v28 }
 0x2a0   :  { %v270_v60 = vpop.f32.mrf.mxu0 }
 0x2a1   :  { %v356_v5 = vmul.f32 0.35355338, %v270_v60 }
 0x2a3   :  { %v382_v6 = vsel %vm1284_vm11, %v356_v5, -1e+30 }
 0x2a4   :  { %v324_v43 = vpop.f32.mrf.mxu2  ;;  %v391_v9 = vsel %vm390_vm12, %v382_v6, -inf }
 0x2a5   :  { %v360_v44 = vmul.f32 0.35355338, %v324_v43 }
 0x2a6   :  { %v297_v53 = vpop.f32.mrf.mxu1 }
 0x2a7   :  { %v1290_v46 = vsel %vm1284_vm11, %v360_v44, -1e+30  ;;  %v358_v59 = vmul.f32 0.35355338, %v297_v53 }
 0x2a8   :  { %v403_v48 = vsel %vm390_vm12, %v1290_v46, -inf  ;;  %v272_v7 = vpop.f32.mrf.mxu0 }
 0x2a9   :  { %404 = vmax.xlane.f32.xlu2 %v403_v48  ;;  %v384_v63 = vsel %vm1284_vm11, %v358_v59, -1e+30  ;;  %v357_v11 = vmul.f32 0.35355338, %v272_v7 }
 0x2aa   :  { %v397_v4 = vsel %vm390_vm12, %v384_v63, -inf }
 0x2ab   :  { %v383_v12 = vsel %vm1294_vm15, %v357_v11, -1e+30 }
 0x2ac   :  { %v326_v49 = vpop.f32.mrf.mxu2  ;;  %v351_v50 = vpop.f32.mrf.mxu3  ;;  %v394_v15 = vsel %vm390_vm12, %v383_v12, -inf }
 0x2ad   :  { %v361_v51 = vmul.f32 0.35355338, %v326_v49  ;;  %v362_v52 = vmul.f32 0.35355338, %v351_v50 }
 0x2ae   :  { %v299_v13 = vpop.f32.mrf.mxu1 }
 0x2af   :  { %v1300_v55 = vsel %vm1284_vm11, %v362_v52, -1e+30  ;;  %v1304_v56 = vsel %vm1294_vm15, %v361_v51, -1e+30  ;;  %v359_v16 = vmul.f32 0.35355338, %v299_v13 }
 0x2b0   :  { %v409_v57 = vsel %vm390_vm12, %v1300_v55, -inf  ;;  %v406_v58 = vsel %vm390_vm12, %v1304_v56, -inf }
 0x2b1   :  { %410 = vmax.xlane.f32.xlu1 %v409_v57  ;;  %407 = vmax.xlane.f32.xlu0 %v406_v58  ;;  %v385_v17 = vsel %vm1294_vm15, %v359_v16, -1e+30 }
 0x2b2   :  { %v400_v18 = vsel %vm390_vm12, %v385_v17, -inf }
 0x2b4   :  { %v353_v61 = vpop.f32.mrf.mxu3 }
 0x2b5   :  { %v363_v62 = vmul.f32 0.35355338, %v353_v61 }
 0x2b7   :  { %v389_v1 = vsel %vm1294_vm15, %v363_v62, -1e+30 }
 0x2b8   :  { %v412_v3 = vsel %vm390_vm12, %v389_v1, -inf }
 0x2b9   :  { %413 = vmax.xlane.f32.xlu2 %v412_v3  ;;  %398 = vmax.xlane.f32.xlu0 %v397_v4 }
 0x2c1   :  { %392 = vmax.xlane.f32.xlu2 %v391_v9 }
 0x2c9   :  { %395 = vmax.xlane.f32.xlu2 %v394_v15 }
 0x2d1   :  { %401 = vmax.xlane.f32.xlu2 %v400_v18 }
 0x2e9   :  { %542 = vrot.lane.b32.xlu2 %v1266_v24, %s1133_s2 }
 0x31c   :  { %v405_v19 = vpop.xlane.xlu2 %404 }
 0x31d   :  { %v419_v33 = vsub.f32 %v1290_v46, %v405_v19 }
 0x31f   :  { %v431_v24 = vmul.f32 1.442695, %v419_v33 }
 0x324   :  { %v408_v20 = vpop.xlane.xlu0 %407  ;;  %v411_v35 = vpop.xlane.xlu1 %410 }
 0x325   :  { %v421_v40 = vsub.f32 %v1300_v55, %v411_v35  ;;  %v420_v49 = vsub.f32 %v1304_v56, %v408_v20 }
 0x327   :  { %v435_v44 = vmul.f32 1.442695, %v421_v40  ;;  %v433_v53 = vmul.f32 1.442695, %v420_v49  ;;  %v598_v49 = vld [vmem:[%s1455_s4 + $0xc] sm:$0xf] }
 0x32c   :  { %v414_v21 = vpop.xlane.xlu2 %413  ;;  %v399_v22 = vpop.xlane.xlu0 %398 }
 0x32d   :  { %v417_v23 = vsub.f32 %v384_v63, %v399_v22  ;;  %v422_v26 = vsub.f32 %v389_v1, %v414_v21 }
 0x32f   :  { %v427_v25 = vmul.f32 1.442695, %v417_v23  ;;  %v437_v27 = vmul.f32 1.442695, %v422_v26 }
 0x331   :  { %1065 = vpow2.f32 %v427_v25 }
 0x332   :  { %1067 = vpow2.f32 %v437_v27 }
 0x334   :  { %v393_v29 = vpop.xlane.xlu2 %392 }
 0x335   :  { %v415_v30 = vsub.f32 %v382_v6, %v393_v29 }
 0x337   :  { %v423_v31 = vmul.f32 1.442695, %v415_v30  ;;  %v1066_v32 = vpop.eup %1065 }
 0x338   :  { %v445_v34 = vsel %vm390_vm12, %v1066_v32, 0.0  ;;  %v1068_v38 = vpop.eup %1067 }
 0x339   :  { %1069 = vpow2.f32 %v423_v31  ;;  %446 = vadd.xlane.f32.xlu1 %v445_v34  ;;  %v460_v43 = vsel %vm390_vm12, %v1068_v38, 0.0 }
 0x33a   :  { %1071 = vpow2.f32 %v431_v24 }
 0x33c   :  { %v396_v36 = vpop.xlane.xlu2 %395 }
 0x33d   :  { %v416_v37 = vsub.f32 %v383_v12, %v396_v36 }
 0x33f   :  { %v1329_v39 = vpop.eup %1069  ;;  %v425_v41 = vmul.f32 1.442695, %v416_v37 }
 0x340   :  { %v439_v42 = vsel %vm390_vm12, %v1329_v39, 0.0  ;;  %v1072_v47 = vpop.eup %1071 }
 0x341   :  { %1073 = vpow2.f32 %v425_v41  ;;  %440 = vadd.xlane.f32.xlu0 %v439_v42  ;;  %461 = vadd.xlane.f32.xlu1 %v460_v43  ;;  %v451_v52 = vsel %vm390_vm12, %v1072_v47, 0.0 }
 0x342   :  { %1075 = vpow2.f32 %v435_v44 }
 0x344   :  { %v402_v45 = vpop.xlane.xlu2 %401 }
 0x345   :  { %v418_v46 = vsub.f32 %v385_v17, %v402_v45 }
 0x347   :  { %v1335_v48 = vpop.eup %1073  ;;  %v429_v50 = vmul.f32 1.442695, %v418_v46 }
 0x348   :  { %v442_v51 = vsel %vm390_vm12, %v1335_v48, 0.0  ;;  %v1076_v55 = vpop.eup %1075 }
 0x349   :  { %1077 = vpow2.f32 %v429_v50  ;;  %443 = vadd.xlane.f32.xlu2 %v442_v51  ;;  %452 = vadd.xlane.f32.xlu1 %v451_v52  ;;  %v457_v58 = vsel %vm390_vm12, %v1076_v55, 0.0  ;;  %v684_v50 = vsel %vm607_vm1, %v598_v49, 0  ;;  %v597_v51 = vld [vmem:[%s1455_s4 + $0x8] sm:$0xf] }
 0x34a   :  { %1079 = vpow2.f32 %v433_v53  ;;  %v659_v52 = vsel %vm607_vm1, %v597_v51, 0  ;;  %v595_v53 = vld [vmem:[%s1455_s4] sm:$0xf] }
 0x34c   :  { %v543_v54 = vpop.permute.xlu2 %542 }
 0x34d   :  { %555 = vmatpush.bf16.msrb.mxu2 %v543_v54  ;;  %v609_v54 = vsel %vm607_vm1, %v595_v53, 0 }
 0x34f   :  { %v1078_v57 = vpop.eup %1077 }
 0x350   :  { %v448_v59 = vsel %vm390_vm12, %v1078_v57, 0.0  ;;  %v1080_v56 = vpop.eup %1079 }
 0x351   :  { %458 = vadd.xlane.f32.xlu2 %v457_v58  ;;  %449 = vadd.xlane.f32.xlu0 %v448_v59  ;;  %v454_v60 = vsel %vm390_vm12, %v1080_v56, 0.0 }
 0x352   :  { %668 = vmatpush.bf16.msra.mxu2 %v659_v52 }
 0x359   :  { %455 = vadd.xlane.f32.xlu0 %v454_v60 }
 0x362   :  { %567 = vrot.lane.b32.xlu1 %v1269_v28, %s1133_s2 }
 0x369   :  { %517 = vrot.lane.b32.xlu2 %v1263_v14, %s1133_s2 }
 0x36d   :  { %492 = vrot.lane.b32.xlu0 %v1260_v8, %s1133_s2 }
 0x3ac   :  { %v447_v61 = vpop.xlane.xlu1 %446 }
 0x3ad   :  { %1081 = vrcp.f32 %v447_v61 }
 0x3b3   :  { %v1082_v6 = vpop.eup %1081 }
 0x3b4   :  { %v462_v62 = vpop.xlane.xlu1 %461  ;;  %v441_v63 = vpop.xlane.xlu0 %440  ;;  %v473_v28 = vmul.f32 %v1082_v6, %v1066_v32 }
 0x3b5   :  { %1083 = vrcp.f32 %v462_v62 }
 0x3b6   :  { %v481_v15 = vpack.c.bf16 %v473_v28, %v473_v28 }
 0x3b8   :  { %v514_v21 = vunpack.c.l.b16 %v481_v15 }
 0x3bb   :  { %v1084_v7 = vpop.eup %1083 }
 0x3bc   :  { %v444_v1 = vpop.xlane.xlu2 %443  ;;  %v453_v3 = vpop.xlane.xlu1 %452  ;;  %v478_v16 = vmul.f32 %v1084_v7, %v1068_v38 }
 0x3be   :  { %v486_v22 = vpack.c.bf16 %v478_v16, %v478_v16 }
 0x3c0   :  { %v565_v33 = vunpack.c.l.b16 %v486_v22 }
 0x3c4   :  { %v459_v4 = vpop.xlane.xlu2 %458  ;;  %v450_v5 = vpop.xlane.xlu0 %449 }
 0x3c5   :  { %1085 = vrcp.f32 %v459_v4 }
 0x3c6   :  { %1087 = vrcp.f32 %v450_v5 }
 0x3c7   :  { %1089 = vrcp.f32 %v453_v3 }
 0x3c8   :  { %1091 = vrcp.f32 %v444_v1 }
 0x3cb   :  { %v1086_v9 = vpop.eup %1085 }
 0x3cc   :  { %v1088_v14 = vpop.eup %1087  ;;  %v477_v11 = vmul.f32 %v1086_v9, %v1076_v55  ;;  %v518_v8 = vpop.permute.xlu2 %517 }
 0x3cd   :  { %v456_v12 = vpop.xlane.xlu0 %455  ;;  %v1090_v13 = vpop.eup %1089  ;;  %v474_v17 = vmul.f32 %v1088_v14, %v1078_v57  ;;  %530 = vmatpush.bf16.msrb.mxu1 %v518_v8 }
 0x3ce   :  { %1093 = vrcp.f32 %v456_v12  ;;  %v485_v18 = vpack.c.bf16 %v477_v11, %v477_v11  ;;  %v475_v20 = vmul.f32 %v1090_v13, %v1072_v47  ;;  %v1092_v25 = vpop.eup %1091 }
 0x3cf   :  { %1095 = vrcp.f32 %v441_v63  ;;  %v482_v19 = vpack.c.bf16 %v474_v17, %v474_v17  ;;  %v472_v34 = vmul.f32 %v1092_v25, %v1335_v48 }
 0x3d0   :  { %v564_v27 = vunpack.c.l.b16 %v485_v18  ;;  %v483_v31 = vpack.c.bf16 %v475_v20, %v475_v20 }
 0x3d1   :  { %v515_v23 = vunpack.c.l.b16 %v482_v19  ;;  %v480_v41 = vpack.c.bf16 %v472_v34, %v472_v34 }
 0x3d2   :  { %v566_v37 = vpack.c.b16 %v565_v33, %v564_v27  ;;  %v539_v38 = vunpack.c.l.b16 %v483_v31 }
 0x3d3   :  { %v516_v29 = vpack.c.b16 %v515_v23, %v514_v21  ;;  %v490_v44 = vunpack.c.l.b16 %v480_v41 }
 0x3d4   :  { %v1094_v26 = vpop.eup %1093  ;;  %v568_v24 = vpop.permute.xlu1 %567 }
 0x3d5   :  { %v1096_v30 = vpop.eup %1095  ;;  %v476_v32 = vmul.f32 %v1094_v26, %v1080_v56  ;;  %980 = vmatmul.msk.bf16.vlgmr.msrb.gmra.mxu1 %vm390_vm12, %v516_v29  ;;  %580 = vmatpush.bf16.msra.mxu3 %v568_v24 }
 0x3d6   :  { %v471_v36 = vmul.f32 %v1096_v30, %v1329_v39  ;;  %v596_v39 = vld [vmem:[%s1455_s4 + $0x4] sm:$0xf] }
 0x3d7   :  { %v484_v35 = vpack.c.bf16 %v476_v32, %v476_v32  ;;  %v634_v48 = vsel %vm607_vm1, %v596_v39, 0  ;;  %v1054_v32 = vld [vmem:[%s1456_s5] ss:$0 sm:$0xff]  ;;  %s925_s5 = sshll.u32 %s1134_s14, 4  ;;  %s926_s5 = int_to_ptr.vmem [resolvable:$true] %s925_s5 }
 0x3d8   :  { %982 = vmatmul.msk.bf16.vlgmr.msra.gmra.mxu3 %vm390_vm12, %v566_v37  ;;  %v479_v43 = vpack.c.bf16 %v471_v36, %v471_v36  ;;  %643 = vmatpush.bf16.msra.mxu1 %v634_v48 }
 0x3d9   :  { %v540_v40 = vunpack.c.l.b16 %v484_v35  ;;  %693 = vmatpush.bf16.msrb.mxu3 %v684_v50 }
 0x3da   :  { %v489_v45 = vunpack.c.l.b16 %v479_v43 }
 0x3db   :  { %v541_v42 = vpack.c.b16 %v540_v40, %v539_v38 }
 0x3dc   :  { %v491_v47 = vpack.c.b16 %v490_v44, %v489_v45 }
 0x3dd   :  { %981 = vmatmul.msk.bf16.vlgmr.msrb.gmra.mxu2 %vm390_vm12, %v541_v42 }
 0x3df   :  { %v493_v46 = vpop.permute.xlu0 %492 }
 0x3e0   :  { %505 = vmatpush.bf16.msra.mxu0 %v493_v46 }
 0x3e3   :  { %979 = vmatmul.msk.bf16.vlgmr.msra.gmra.mxu0 %vm390_vm12, %v491_v47 }
 0x3e4   :  { %618 = vmatpush.bf16.msrb.mxu0 %v609_v54 }
 0x452   :  { %v532_v55 = vpop.f32.mrf.mxu1 }
 0x453   :  { %v589_v57 = vpack.c.bf16 %v532_v55, %v532_v55 }
 0x455   :  { %v627_v60 = vunpack.c.l.b16 %v589_v57 }
 0x45a   :  { %v534_v58 = vpop.f32.mrf.mxu1 }
 0x45b   :  { %v590_v59 = vpack.c.bf16 %v534_v58, %v534_v58  ;;  %v582_v56 = vpop.f32.mrf.mxu3 }
 0x45c   :  { %v593_v3 = vpack.c.bf16 %v582_v56, %v582_v56  ;;  %v1037_v56 = vld [vmem:[%s1459_s8 + $0x8] sm:$0xff] }
 0x45d   :  { %v628_v61 = vunpack.c.l.b16 %v590_v59  ;;  %808 = vmatpush.bf16.msra.mxu0 %v1037_v56 }
 0x45e   :  { %v677_v28 = vunpack.c.l.b16 %v593_v3 }
 0x45f   :  { %v629_v62 = vpack.c.b16 %v628_v61, %v627_v60 }
 0x460   :  { %v557_v63 = vpop.f32.mrf.mxu2  ;;  %v507_v1 = vpop.f32.mrf.mxu0 }
 0x461   :  { %984 = vmatmul.msk.bf16.vlgmr.msra.gmra.mxu1 %vm254_vm8, %v629_v62  ;;  %v591_v6 = vpack.c.bf16 %v557_v63, %v557_v63  ;;  %v587_v7 = vpack.c.bf16 %v507_v1, %v507_v1  ;;  %v1036_v63 = vld [vmem:[%s1459_s8] sm:$0xff]  ;;  %s1136_s8 = smov 8  }
 0x462   :  { %809 = vmatpush.bf16.msra.mxu0 %v1036_v63 }
 0x463   :  { %v584_v4 = vpop.f32.mrf.mxu3  ;;  %v652_v15 = vunpack.c.l.b16 %v591_v6  ;;  %v601_v17 = vunpack.c.l.b16 %v587_v7 }
 0x464   :  { %v594_v5 = vpack.c.bf16 %v584_v4, %v584_v4 }
 0x466   :  { %v678_v9 = vunpack.c.l.b16 %v594_v5 }
 0x468   :  { %v559_v14 = vpop.f32.mrf.mxu2  ;;  %v509_v8 = vpop.f32.mrf.mxu0  ;;  %v679_v12 = vpack.c.b16 %v678_v9, %v677_v28 }
 0x469   :  { %v592_v11 = vpack.c.bf16 %v559_v14, %v559_v14  ;;  %v588_v13 = vpack.c.bf16 %v509_v8, %v509_v8 }
 0x46a   :  { %986 = vmatmul.msk.bf16.vlgmr.msrb.gmra.mxu3 %vm254_vm8, %v679_v12 }
 0x46b   :  { %v653_v16 = vunpack.c.l.b16 %v592_v11  ;;  %v602_v18 = vunpack.c.l.b16 %v588_v13 }
 0x46d   :  { %v654_v19 = vpack.c.b16 %v653_v16, %v652_v15  ;;  %v603_v20 = vpack.c.b16 %v602_v18, %v601_v17 }
 0x46f   :  { %985 = vmatmul.msk.bf16.vlgmr.msra.gmra.mxu2 %vm254_vm8, %v654_v19  ;;  %983 = vmatmul.msk.bf16.vlgmr.msrb.gmra.mxu0 %vm254_vm8, %v603_v20  ;;  %v1056_v20 = vld [vmem:[%s1458_s7] ss:$0 sm:$0xff] }
 0x4de   :  { %v645_v21 = vpop.f32.mrf.mxu1 }
 0x4df   :  { %v701_v26 = vsel %vm47_vm0, %v645_v21, 0.0 }
 0x4e6   :  { %v647_v24 = vpop.f32.mrf.mxu1 }
 0x4e7   :  { %v708_v38 = vsel %vm47_vm0, %v647_v24, 0.0  ;;  %v1039_v24 = vld [vmem:[%s1461_s10 + $0x8] sm:$0xff] }
 0x4ec   :  { %v620_v22 = vpop.f32.mrf.mxu0 }
 0x4ed   :  { %v700_v23 = vsel %vm47_vm0, %v620_v22, 0.0  ;;  %v695_v25 = vpop.f32.mrf.mxu3 }
 0x4ee   :  { %v702_v27 = vadd.f32 %v701_v26, %v700_v23  ;;  %v705_v33 = vsel %vm47_vm0, %v695_v25, 0.0 }
 0x4f2   :  { %v670_v29 = vpop.f32.mrf.mxu2 }
 0x4f3   :  { %v703_v30 = vsel %vm47_vm0, %v670_v29, 0.0  ;;  %v1045_v29 = vld [vmem:[%s1461_s10 + $0x38] sm:$0xff] }
 0x4f4   :  { %v704_v31 = vadd.f32 %v703_v30, %v702_v27  ;;  %v622_v34 = vpop.f32.mrf.mxu0  ;;  %903 = vmatpush.bf16.msrb.mxu1 %v1045_v29  ;;  %v1044_v30 = vld [vmem:[%s1461_s10 + $0x30] sm:$0xff] }
 0x4f5   :  { %v707_v36 = vsel %vm47_vm0, %v622_v34, 0.0  ;;  %v697_v41 = vpop.f32.mrf.mxu3  ;;  %v1040_v34 = vld [vmem:[%s1461_s10 + $0x10] sm:$0xff] }
 0x4f6   :  { %v706_v35 = vadd.f32 %v705_v33, %v704_v31  ;;  %v709_v40 = vadd.f32 %v708_v38, %v707_v36  ;;  %v712_v47 = vsel %vm47_vm0, %v697_v41, 0.0  ;;  %v1043_v31 = vld [vmem:[%s1461_s10 + $0x28] sm:$0xff]  ;;  %v1041_v33 = vld [vmem:[%s1461_s10 + $0x18] sm:$0xff]  ;;  %v1057_v36 = vld [vmem:[%s1460_s9] ss:$0 sm:$0xff] }
 0x4f8   :  { %v718_v37 = vadd.f32 %v1054_v32, %v706_v35  ;;  %904 = vmatpush.bf16.msrb.mxu1 %v1044_v30  ;;  %v1038_v35 = vld [vmem:[%s1461_s10] sm:$0xff] }
 0x4fa   :  { %v672_v42 = vpop.f32.mrf.mxu2  ;;  %v1382_v43 = vadd.f32 %v718_v37, %v1205_v0 }
 0x4fb   :  { %v710_v44 = vsel %vm47_vm0, %v672_v42, 0.0 }
 0x4fc   :  { %v711_v45 = vadd.f32 %v710_v44, %v709_v40  ;;  %v724_v46 = vsel %vm47_vm0, %v1382_v43, 0.0  ;;  %905 = vmatpush.bf16.msrb.mxu1 %v1043_v31 }
 0x4fd   :  { %725 = vadd.xlane.f32.xlu0 %v724_v46 }
 0x4fe   :  { %v713_v39 = vadd.f32 %v712_v47, %v711_v45 }
 0x500   :  { %v719_v48 = vadd.f32 %v1054_v32, %v713_v39  ;;  %v1042_v32 = vld [vmem:[%s1461_s10 + $0x20] sm:$0xff] }
 0x501   :  { %906 = vmatpush.bf16.msrb.mxu1 %v1042_v32 }
 0x502   :  { %v1389_v49 = vadd.f32 %v719_v48, %v1212_v2 }
 0x504   :  { %v727_v50 = vsel %vm47_vm0, %v1389_v49, 0.0 }
 0x505   :  { %728 = vadd.xlane.f32.xlu1 %v727_v50  ;;  %907 = vmatpush.bf16.msrb.mxu1 %v1041_v33 }
 0x509   :  { %908 = vmatpush.bf16.msrb.mxu1 %v1040_v34 }
 0x50d   :  { %909 = vmatpush.bf16.msrb.mxu1 %v1039_v24 }
 0x511   :  { %910 = vmatpush.bf16.msrb.mxu1 %v1038_v35 }
 0x570   :  { %v726_v0 = vpop.xlane.xlu0 %725 }
 0x571   :  { %v730_v51 = vmul.f32 %v726_v0, %v1216_v10 }
 0x573   :  { %v732_v52 = vsub.f32 %v1382_v43, %v730_v51 }
 0x575   :  { %v734_v53 = vmul.f32 %v732_v52, %v732_v52 }
 0x577   :  { %v736_v54 = vsel %vm47_vm0, %v734_v53, 0.0 }
 0x578   :  { %737 = vadd.xlane.f32.xlu2 %v736_v54  ;;  %v729_v55 = vpop.xlane.xlu1 %728 }
 0x579   :  { %v731_v57 = vmul.f32 %v729_v55, %v1216_v10 }
 0x57b   :  { %v733_v58 = vsub.f32 %v1389_v49, %v731_v57 }
 0x57d   :  { %v735_v2 = vmul.f32 %v733_v58, %v733_v58 }
 0x57f   :  { %v739_v59 = vsel %vm47_vm0, %v735_v2, 0.0 }
 0x580   :  { %740 = vadd.xlane.f32.xlu0 %v739_v59 }
 0x5eb   :  { %v738_v60 = vpop.xlane.xlu2 %737 }
 0x5ec   :  { %v742_v61 = vmul.f32 %v738_v60, %v1216_v10  ;;  %v1058_v60 = vld [vmem:[%s1462_s11] ss:$0 sm:$0xff]  ;;  %s1135_s11 = smov 128  }
 0x5ee   :  { %v744_v62 = vadd.f32 1e-05, %v742_v61 }
 0x5f0   :  { %1097 = vrsqrt.f32 %v744_v62  ;;  %vm752_vm3 = vweird.f32 %v744_v62 }
 0x5f3   :  { %v741_v1 = vpop.xlane.xlu0 %740 }
 0x5f4   :  { %v743_v3 = vmul.f32 %v741_v1, %v1216_v10  ;;  %v1055_v10 = vld [vmem:[%s1457_s6] ss:$0 sm:$0xff] }
 0x5f6   :  { %v1098_v4 = vpop.eup %1097  ;;  %v745_v5 = vadd.f32 1e-05, %v743_v3 }
 0x5f7   :  { %v747_v6 = vmul.f32 %v1098_v4, %v744_v62  ;;  %vm753_vm2 = vweird.f32 %v1098_v4 }
 0x5f8   :  { %1099 = vrsqrt.f32 %v745_v5  ;;  %vm754_vm4 = vmor %vm752_vm3, %vm753_vm2  ;;  %vm762_vm6 = vweird.f32 %v745_v5 }
 0x5f9   :  { %v748_v28 = vmul.f32 %v1098_v4, %v747_v6 }
 0x5fb   :  { %v749_v7 = vmul.f32 0.5, %v748_v28 }
 0x5fd   :  { %v750_v9 = vsub.f32 1.5, %v749_v7 }
 0x5fe   :  { %v1100_v14 = vpop.eup %1099 }
 0x5ff   :  { %v751_v11 = vmul.f32 %v1098_v4, %v750_v9  ;;  %v757_v8 = vmul.f32 %v1100_v14, %v745_v5  ;;  %vm763_vm5 = vweird.f32 %v1100_v14 }
 0x600   :  { %vm764_vm7 = vmor %vm762_vm6, %vm763_vm5 }
 0x601   :  { %v758_v12 = vmul.f32 %v1100_v14, %v757_v8  ;;  %v755_v13 = vsel %vm754_vm4, %v1098_v4, %v751_v11 }
 0x602   :  { %v766_v17 = vmul.f32 %v755_v13, %v732_v52 }
 0x603   :  { %v759_v15 = vmul.f32 0.5, %v758_v12 }
 0x604   :  { %v771_v21 = vmul.f32 %v1055_v10, %v766_v17 }
 0x605   :  { %v760_v16 = vsub.f32 1.5, %v759_v15 }
 0x606   :  { %v776_v25 = vadd.f32 %v1056_v20, %v771_v21 }
 0x607   :  { %v761_v18 = vmul.f32 %v1100_v14, %v760_v16 }
 0x609   :  { %v765_v19 = vsel %vm764_vm7, %v1100_v14, %v761_v18 }
 0x60a   :  { %v767_v22 = vmul.f32 %v765_v19, %v733_v58 }
 0x60c   :  { %v772_v23 = vmul.f32 %v1055_v10, %v767_v22 }
 0x60e   :  { %v777_v26 = vadd.f32 %v1056_v20, %v772_v23 }
 0x610   :  { %v778_v27 = vpack.c.bf16 %v777_v26, %v776_v25 }
 0x612   :  { %995 = vmatmul.msk.bf16.vlgmr.msra.gmra.mxu0 %vm47_vm0, %v778_v27 }
 0x68f   :  { %v811_v37 = vpop.f32.mrf.mxu0 }
 0x690   :  { %v812_v38 = vadd.f32 %v1057_v36, %v811_v37 }
 0x692   :  { %v818_v40 = vmul.f32 %v812_v38, %v812_v38  ;;  %v816_v55 = vmul.f32 0.5, %v812_v38 }
 0x694   :  { %v820_v41 = vmul.f32 %v818_v40, %v812_v38 }
 0x696   :  { %v822_v42 = vmul.f32 0.044715, %v820_v41 }
 0x697   :  { %v813_v44 = vpop.f32.mrf.mxu0 }
 0x698   :  { %v824_v45 = vadd.f32 %v822_v42, %v812_v38  ;;  %v814_v46 = vadd.f32 %v1057_v36, %v813_v44 }
 0x69a   :  { %v819_v47 = vmul.f32 %v814_v46, %v814_v46  ;;  %v826_v39 = vmul.f32 0.7978845, %v824_v45  ;;  %v817_v57 = vmul.f32 0.5, %v814_v46 }
 0x69c   :  { %v821_v48 = vmul.f32 %v819_v47, %v814_v46  ;;  %1101 = vtanh.f32 %v826_v39 }
 0x69e   :  { %v823_v50 = vmul.f32 0.044715, %v821_v48 }
 0x6a0   :  { %v825_v0 = vadd.f32 %v823_v50, %v814_v46 }
 0x6a2   :  { %v827_v51 = vmul.f32 0.7978845, %v825_v0  ;;  %v1102_v52 = vpop.eup %1101 }
 0x6a3   :  { %v830_v53 = vadd.f32 1.0, %v1102_v52 }
 0x6a4   :  { %1103 = vtanh.f32 %v827_v51 }
 0x6a5   :  { %v832_v2 = vmul.f32 %v830_v53, %v816_v55 }
 0x6aa   :  { %v1104_v54 = vpop.eup %1103 }
 0x6ab   :  { %v831_v58 = vadd.f32 1.0, %v1104_v54 }
 0x6ad   :  { %v833_v59 = vmul.f32 %v831_v58, %v817_v57 }
 0x6af   :  { %v834_v56 = vpack.c.bf16 %v833_v59, %v832_v2 }
 0x6b1   :  { %911 = vmatmul.bf16.vlgmr.msrb.gmra.mxu1 %v834_v56 }
 0x72e   :  { %v912_v61 = vpop.f32.mrf.mxu1 }
 0x72f   :  { %v913_v62 = vadd.f32 %v1058_v60, %v912_v61 }
 0x731   :  { %v917_v63 = vadd.f32 %v913_v62, %v1382_v43 }
 0x733   :  { %919 = vst.msk [vmem:[#allocation2] sm:$0xff] %vm47_vm0, %v917_v63 }
 0x736   :  { %v914_v1 = vpop.f32.mrf.mxu1 }
 0x737   :  { %v915_v3 = vadd.f32 %v1058_v60, %v914_v1 }
 0x739   :  { %v918_v4 = vadd.f32 %v915_v3, %v1389_v49 }
 0x73b   :  { %920 = vst.msk [vmem:[#allocation2 + $0x8] sm:$0xff] %vm47_vm0, %v918_v4 }
 0x73c   :  { %933 = dma.vmem_to_hbm [thread:$0]  %s926_s5, 256, %s928_s17, [#allocation3], %s1135_s11, %s1135_s11, %s1136_s8  }
 0x73d   :  { %1129 = dma.done.wait [#allocation3], 256  }
 0x73e   :  { %1130 = vsyncadd [#allocation3], 4294967040 }
 0x73f   :  { %938 = vsyncpa [#allocation3], 1 }

</bundles_post_ra>
